<compile_context>
chip_gen: v5e
topology: v5e:2x2
jax: 0.10.0
libtpu: 0.0.40
codegen_flags: <defaults>
</compile_context>

<pallas_src>
import functools
import math

import jax
import jax.numpy as jnp
from jax.experimental import pallas as pl
from jax.experimental.pallas import tpu as pltpu


def _round_up(x, m):
    return ((x + m - 1) // m) * m


# ---------------------------------------------------------------------------
# Kernel 1: bias-folded fused K|V projection of the messages (prologue; runs
# exactly once per message tile -> hoisted out of the reduction loop).
# ---------------------------------------------------------------------------
def _kv_proj_kernel(msgs_ref, wkv_ref, kv_ref):
    kv_ref[...] = jnp.dot(msgs_ref[...], wkv_ref[...],
                          preferred_element_type=jnp.float32).astype(kv_ref.dtype)


# ---------------------------------------------------------------------------
# Kernel 2: scatter-mean aggregation (message-axis reduction) + per-node
# multi-head cross attention + output projection.
# ---------------------------------------------------------------------------
def _agg_attn_kernel(node_ref, kv_ref, idx_ref,
                     wq_ref, bq_ref, wo_ref, bo_ref,
                     eq_ref, ek_ref, bs_ref, gs_ref, smask_ref,
                     out_ref, kv_acc,
                     *, head_dim, hp, node_tile):
    i = pl.program_id(0)          # node-tile index    ("parallel")
    j = pl.program_id(1)          # message-tile index ("arbitrary" reduction)
    nj = pl.num_programs(1)
    bf = jnp.bfloat16

    @pl.when(j == 0)
    def _():
        kv_acc[...] = jnp.zeros_like(kv_acc)

    # ---- scatter-sum via one-hot @ features on the MXU --------------------
    # Only the compare + select are NT*MT sized; the tile offset is applied to
    # the [1, MT] index row and the row ids are a cheap (NT, 1) iota.
    idx_local = idx_ref[...] - i * node_tile                       # [1, MT] i32
    row_ids = jax.lax.broadcasted_iota(jnp.int32, (node_tile, 1), 0)
    onehot = (row_ids == idx_local).astype(bf)                     # [NT, MT]; pad idx=-1 never matches
    kv_acc[...] += jnp.dot(onehot, kv_ref[...],
                           preferred_element_type=jnp.float32)     # [NT, 2*HP] f32

    @pl.when(j == nj - 1)
    def _():
        # ---- finalize scatter-mean (empty groups -> 0, matching torch scatter)
        counts = kv_acc[:, hp - 1:hp]                              # fused count column
        kv_mean = kv_acc[...] / jnp.maximum(counts, 1.0)           # exact divide (once/tile)
        k_agg = kv_mean[:, :hp]
        v_agg = kv_mean[:, hp:]

        # ---- Q projection --------------------------------------------------
        q = (jnp.dot(node_ref[...], wq_ref[...],
                     preferred_element_type=jnp.float32) + bq_ref[...])   # [NT, HP] f32

        # ---- heads x heads cross attention, all on the MXU -----------------
        # qe[n,(h*H+m)*D+d] = q[n,h*D+d]   (EQ gather)
        # ke[n,(h*H+m)*D+d] = k_agg[n,m*D+d] (EK gather)
        qe = jnp.dot(q.astype(bf), eq_ref[...], preferred_element_type=jnp.float32)
        ke = jnp.dot(k_agg.astype(bf), ek_ref[...], preferred_element_type=jnp.float32)
        scale = 1.0 / math.sqrt(head_dim)
        # scores[n, h*H+m] = sum_d q[n,h,d] * k_agg[n,m,d]  (BS block-sum matmul)
        scores = jnp.dot((qe * ke).astype(bf), bs_ref[...],
                         preferred_element_type=jnp.float32) * scale      # [NT, SP] f32
        # Explicitly mask padded score columns (-1e30) before the stabilizer.
        scores = scores + smask_ref[...]

        rowmax = jnp.max(scores, axis=-1, keepdims=True)
        e = jnp.exp(scores - rowmax)                               # padded cols underflow to 0
        den = jnp.dot(e.astype(bf), gs_ref[...],
                      preferred_element_type=jnp.float32)          # per-head group sum, pre-broadcast
        attn = e / jnp.maximum(den, 1e-20)

        # attention_output[n, h*D+d] = sum_m attn[n,h,m] * v_agg[n,m*D+d]
        #   (AE = BS.T and SC = EQ.T expressed as transposed contractions)
        attn_e = jnp.dot(attn.astype(bf), bs_ref[...].T,
                         preferred_element_type=jnp.float32)       # [NT, WP]
        ve = jnp.dot(v_agg.astype(bf), ek_ref[...], preferred_element_type=jnp.float32)
        attn_out = jnp.dot((attn_e * ve).astype(bf), eq_ref[...].T,
                           preferred_element_type=jnp.float32)     # [NT, HP]

        # TODO(synk): nn.Dropout(p=0.3) treated as identity (eval/inference mode).
        out = (jnp.dot(attn_out.astype(bf), wo_ref[...],
                       preferred_element_type=jnp.float32) + bo_ref[...])
        out_ref[...] = out.astype(out_ref.dtype)                   # lane-dense [NT, 128k] store


def init_params(key, input_dim, hidden_dim, out_dim):
    """Deterministic PyTorch-style Linear init (uniform +-1/sqrt(fan_in))."""
    ks = jax.random.split(key, 8)

    def lin(kw, kb, fan_in, fan_out):
        bound = 1.0 / math.sqrt(fan_in)
        w = jax.random.uniform(kw, (fan_in, fan_out), jnp.float32, -bound, bound)
        b = jax.random.uniform(kb, (1, fan_out), jnp.float32, -bound, bound)
        return w, b

    wq, bq = lin(ks[0], ks[1], input_dim, hidden_dim)
    wk, bk = lin(ks[2], ks[3], out_dim, hidden_dim)
    wv, bv = lin(ks[4], ks[5], out_dim, hidden_dim)
    wo, bo = lin(ks[6], ks[7], hidden_dim, out_dim)
    return dict(wq=wq, bq=bq, wk=wk, bk=bk, wv=wv, bv=bv, wo=wo, bo=bo)


def cross_attention_aggregator(params, node, messages, index, t, dim_size, *, heads,
                               node_tile=256, msg_tile=2048):
    num_nodes, input_dim = node.shape
    hidden_dim = params["wq"].shape[1]
    out_dim = params["wo"].shape[1]
    num_msgs = messages.shape[0]
    assert hidden_dim % heads == 0
    head_dim = hidden_dim // heads
    assert node_tile % 8 == 0 and msg_tile % 128 == 0

    if num_msgs == 0:
        return jnp.zeros((num_nodes, out_dim), jnp.float32)

    # The reference einsum 'nhd,nmd->nhm' requires num_nodes == dim_size.
    assert num_nodes == dim_size

    f32, bf16 = jnp.float32, jnp.bfloat16
    H, D = heads, head_dim
    HD = H * D
    W = H * H * D

    # Padded feature widths (everything a multiple of 128 lanes).
    IN_P = _round_up(input_dim, 128)
    OUT_P = _round_up(out_dim + 1, 128)   # +1 lane carries the folded-bias 1.0
    HP = _round_up(HD + 1, 128)           # +1 reserves the fused "count" column
    WP = _round_up(W, 128)
    SP = _round_up(H * H, 128)
    OP = _round_up(out_dim, 128)

    # Node tiling: guarantee >= 2 node tiles so the "parallel" axis feeds both
    # v7x TensorCores even when num_nodes ~ node_tile.
    NT = min(node_tile, _round_up(num_nodes, 8))
    if _round_up(num_nodes, NT) // NT < 2 and num_nodes > 8:
        NT = _round_up((num_nodes + 1) // 2, 8)
    NP = _round_up(num_nodes, NT)
    MT = min(msg_tile, _round_up(num_msgs, 128))
    MP = _round_up(num_msgs, MT)

    def pad2(x, rows, cols):
        return jnp.pad(x, ((0, rows - x.shape[0]), (0, cols - x.shape[1])))

    # ---- padded operands ---------------------------------------------------
    node_p = pad2(node.astype(f32), NP, IN_P).astype(bf16)
    msgs_p = pad2(messages.astype(f32), MP, OUT_P)
    msgs_p = msgs_p.at[:num_msgs, out_dim].set(1.0).astype(bf16)    # folded-bias lane
    idx_p = jnp.full((1, MP), -1, jnp.int32).at[0, :num_msgs].set(index.astype(jnp.int32))

    # Fused K|V weights: biases folded into row `out_dim` (matched to the 1.0
    # lane of msgs_p); the group-COUNT marker is a 1.0 planted in that row's
    # K-half last padded column.  Padded message rows are all-zero -> kv = 0.
    wk = pad2(params["wk"], OUT_P, HP)
    wk = wk.at[out_dim, :HD].set(params["bk"][0])
    wk = wk.at[out_dim, HP - 1].set(1.0)                            # count marker
    wv = pad2(params["wv"], OUT_P, HP)
    wv = wv.at[out_dim, :HD].set(params["bv"][0])
    wkv = jnp.concatenate([wk, wv], axis=1).astype(bf16)            # [OUT_P, 2*HP]

    wq = pad2(params["wq"], IN_P, HP).astype(bf16)
    bq = pad2(params["bq"], 1, HP)                                  # f32
    wo = pad2(params["wo"], HP, OP).astype(bf16)
    bo = pad2(params["bo"], 1, OP)                                  # f32

    # ---- constant 0/1 gather / scatter matrices for the attention ----------
    # For j in [0, W):  h = j // (H*D), m = (j // D) % H, d = j % D, s = j // D.
    jj = jnp.arange(WP)
    hj = jj // (H * D)
    mj = (jj // D) % H
    dj = jj % D
    sj = jj // D
    vj = jj < W
    ii = jnp.arange(HP)
    EQ = ((ii[:, None] == (hj * D + dj)[None, :]) & vj[None, :]).astype(bf16)   # [HP, WP]
    EK = ((ii[:, None] == (mj * D + dj)[None, :]) & vj[None, :]).astype(bf16)   # [HP, WP]
    ss = jnp.arange(SP)
    BS = ((ss[None, :] == sj[:, None]) & vj[:, None]).astype(bf16)              # [WP, SP]
    GS = (((ss[:, None] // H) == (ss[None, :] // H))
          & (ss[:, None] < H * H) & (ss[None, :] < H * H)).astype(bf16)         # [SP, SP]
    SMASK = jnp.where(ss < H * H, 0.0, -1e30).astype(f32)[None, :]              # [1, SP]

    # ---- prologue: hoisted, bias-folded K|V projection ----------------------
    kv = pl.pallas_call(
        _kv_proj_kernel,
        out_shape=jax.ShapeDtypeStruct((MP, 2 * HP), bf16),
        grid_spec=pltpu.PrefetchScalarGridSpec(
            num_scalar_prefetch=0,
            grid=(MP // MT,),
            in_specs=[pl.BlockSpec((MT, OUT_P), lambda j: (j, 0)),
                      pl.BlockSpec((OUT_P, 2 * HP), lambda j: (0, 0))],
            out_specs=pl.BlockSpec((MT, 2 * HP), lambda j: (j, 0)),
        ),
        compiler_params=pltpu.CompilerParams(
            dimension_semantics=("parallel",),
        ),
    )(msgs_p, wkv)

    # ---- main: scatter-mean reduction + cross attention ---------------------
    grid = (NP // NT, MP // MT)
    kernel = functools.partial(_agg_attn_kernel, head_dim=D, hp=HP, node_tile=NT)

    def full(shape):
        return pl.BlockSpec(shape, lambda i, j: (0, 0))

    out_pad = pl.pallas_call(
        kernel,
        out_shape=jax.ShapeDtypeStruct((NP, OP), jnp.float32),
        grid_spec=pltpu.PrefetchScalarGridSpec(
            num_scalar_prefetch=0,
            grid=grid,
            in_specs=[
                pl.BlockSpec((NT, IN_P), lambda i, j: (i, 0)),     # node tile
                pl.BlockSpec((MT, 2 * HP), lambda i, j: (j, 0)),   # projected K|V tile (bf16)
                pl.BlockSpec((1, MT), lambda i, j: (0, j)),        # message index tile
                full((IN_P, HP)), full((1, HP)),                   # Wq, bq
                full((HP, OP)), full((1, OP)),                     # Wo, bo
                full((HP, WP)), full((HP, WP)),                    # EQ, EK
                full((WP, SP)), full((SP, SP)),                    # BS, GS
                full((1, SP)),                                     # softmax pad mask
            ],
            out_specs=pl.BlockSpec((NT, OP), lambda i, j: (i, 0)),
            scratch_shapes=[pltpu.VMEM((NT, 2 * HP), jnp.float32)],
        ),
        compiler_params=pltpu.CompilerParams(
            dimension_semantics=("parallel", "arbitrary"),   # node axis -> both TCs on v7x
            vmem_limit_bytes=40 * 1024 * 1024,               # safe within v7x's 64 MiB VMEM
        ),
    )(node_p, kv, idx_p, wq, bq, wo, bo, EQ, EK, BS, GS, SMASK)

    return out_pad[:num_nodes, :out_dim]


def reference(params, node, messages, index, dim_size, *, heads):
    """Pure-JAX f32 mirror of the PyTorch forward (dropout = identity)."""
    q = node @ params["wq"] + params["bq"]
    k = messages @ params["wk"] + params["bk"]
    v = messages @ params["wv"] + params["bv"]
    hidden = q.shape[1]
    d = hidden // heads
    onehot = (jnp.arange(dim_size)[:, None] == index[None, :]).astype(jnp.float32)
    counts = jnp.maximum(onehot.sum(-1, keepdims=True), 1.0)
    k_agg = (onehot @ k) / counts
    v_agg = (onehot @ v) / counts
    Q = q.reshape(-1, heads, d)
    K = k_agg.reshape(-1, heads, d)
    V = v_agg.reshape(-1, heads, d)
    scores = jnp.einsum('nhd,nmd->nhm', Q, K) / math.sqrt(d)
    attn = jax.nn.softmax(scores, axis=-1)
    out = jnp.einsum('nhm,nmd->nhd', attn, V).reshape(-1, hidden)
    return out @ params["wo"] + params["bo"]


if __name__ == "__main__":
    # Small deterministic example exercising both grid axes:
    # 2 node tiles (>= 2-tile guard) x 2 message tiles (reduction path).
    num_nodes = 200          # == dim_size (required by the reference einsum)
    dim_size = 200
    num_messages = 500
    input_dim = 12
    hidden_dim = 32
    out_dim = 8
    heads = 2

    key = jax.random.PRNGKey(0)
    k_node, k_msg, k_idx, k_par = jax.random.split(key, 4)

    node = jax.random.normal(k_node, (num_nodes, input_dim), jnp.float32)
    messages = jax.random.normal(k_msg, (num_messages, out_dim), jnp.float32)
    index = jax.random.randint(k_idx, (num_messages,), 0, dim_size, jnp.int32)
    t = jnp.zeros((num_messages,), jnp.float32)  # unused, kept for API parity

    params = init_params(k_par, input_dim, hidden_dim, out_dim)

    out = cross_attention_aggregator(params, node, messages, index, t, dim_size,
                                     heads=heads, node_tile=256, msg_tile=256)
    out = jax.block_until_ready(out)

    ref = reference(params, node, messages, index, dim_size, heads=heads)
    assert out.shape == (num_nodes, out_dim)
    # bf16 MXU operands (f32 accumulation) -> compare with a bf16-level tolerance.
    assert jnp.allclose(out, ref, atol=5e-2, rtol=5e-2), "mismatch vs JAX reference"

    print("KERNEL_OK")
</pallas_src>

<mosaic_0001>
module attributes {stable_mosaic.version = 11 : i64} {
  func.func @_kv_proj_kernel(%arg0: i32, %arg1: memref<256x128xbf16, #tpu.memory_space<vmem>>, %arg2: memref<128x256xbf16, #tpu.memory_space<vmem>>, %arg3: memref<256x256xbf16, #tpu.memory_space<vmem>>) attributes {dimension_semantics = [#tpu.dimension_semantics<parallel>], iteration_bounds = array<i64: 2>, scalar_prefetch = 0 : i64, scratch_operands = 0 : i64, tpu.core_type = #tpu.core_type<tc>, window_params = [{transform_indices = @transform_0, window_bounds = array<i64: 256, 128>}, {pipeline_mode = #tpu.pipeline_mode<synchronous>, transform_indices = @transform_1, window_bounds = array<i64: 128, 256>}, {transform_indices = @transform_2, window_bounds = array<i64: 256, 256>}]} {
    %c0 = arith.constant 0 : index
    %c0_0 = arith.constant 0 : index
    %0 = vector.load %arg1[%c0, %c0_0] : memref<256x128xbf16, #tpu.memory_space<vmem>>, vector<256x128xbf16>
    %c0_1 = arith.constant 0 : index
    %c0_2 = arith.constant 0 : index
    %1 = vector.load %arg2[%c0_1, %c0_2] : memref<128x256xbf16, #tpu.memory_space<vmem>>, vector<128x256xbf16>
    %cst = arith.constant dense<0.000000e+00> : vector<256x256xf32>
    %2 = tpu.matmul %0, %1, %cst {dimension_numbers = #tpu.dot_dimension_numbers<[1], [0], [0], [1], [0, 0, 1, 1], [], []>} : vector<256x128xbf16>, vector<128x256xbf16>, vector<256x256xf32> -> vector<256x256xf32>
    %3 = arith.truncf %2 : vector<256x256xf32> to vector<256x256xbf16>
    %c0_3 = arith.constant 0 : index
    %c0_4 = arith.constant 0 : index
    %4 = vector.load %arg3[%c0_3, %c0_4] : memref<256x256xbf16, #tpu.memory_space<vmem>>, vector<256x256xbf16>
    tpu.vector_store %arg3[%c0_3, %c0_4], %3 {strides = array<i32>} : memref<256x256xbf16, #tpu.memory_space<vmem>>, vector<256x256xbf16>,
    return
  }
  func.func @transform_0(%arg0: i32) -> (i32, i32) {
    %c0_i32 = arith.constant 0 : i32
    %c0_i32_0 = arith.constant 0 : i32
    return %arg0, %c0_i32 : i32, i32
  }
  func.func @transform_1(%arg0: i32) -> (i32, i32) {
    %c0_i32 = arith.constant 0 : i32
    %c0_i32_0 = arith.constant 0 : i32
    %c0_i32_1 = arith.constant 0 : i32
    return %c0_i32, %c0_i32_0 : i32, i32
  }
  func.func @transform_2(%arg0: i32) -> (i32, i32) {
    %c0_i32 = arith.constant 0 : i32
    %c0_i32_0 = arith.constant 0 : i32
    return %arg0, %c0_i32 : i32, i32
  }
}

</mosaic_0001>

<bundles_post_ra>
// kernel: tpu_custom_call.1
= control target key start
LH: loop header
LB: loop body
LE: loop exit
PB: predicated region body
PF: predicated region fallthrough
CT: control target
= control target key end

     0   :  { %7 = vsyncpa [#allocation3], 0  ;;  %s1356_s0 = inlined_call_operand.hbm [shape: bf16[512,128], index: 0, kind: input, shape index: {}]   ;;  %s1357_s1 = inlined_call_operand.hbm [shape: bf16[128,256], index: 1, kind: input, shape index: {}]   ;;  %s1358_s2 = inlined_call_operand.hbm [shape: bf16[512,256], index: 2, kind: output, shape index: {}]  }
   0x1   :  { %9 = vsyncpa [#allocation3 + $0x1], 0 }
   0x2   :  { %10 = vsyncpa [#allocation6], 0 }
   0x3   :  { %11 = vsyncpa [#allocation4], 0 }
   0x4   :  { %13 = vsyncpa [#allocation4 + $0x1], 0  ;;  %s1162_s9 = smov 0   ;;  %s1164_s10 = smov 0  }
   0x5   :  { %s1166_s11 = smov 0   ;;  %s1168_s12 = smov 0  }
   0x6 LB: > { %s1183_s13 = sadd.s32 4294967295, %s1138_s12   ;;  %s749_s14 = sadd.s32 4294967294, %s1138_s12   ;;  %s1138_s12 = sphi %s1168_s12, %s1368_s12   ;;  %s1134_s11 = sphi %s1166_s11, %s1367_s11   ;;  %s1130_s10 = sphi %s1164_s10, %s1366_s10   ;;  %s1126_s9 = sphi %s1162_s9, %s1365_s9  }
   0x7   : > { %p39_p0 = scmp.ne.s32.totalorder %s1130_s10, %s1126_s9  ;;  %p40_p1 = scmp.eq.s32.totalorder %s1183_s13, 0 }
   0x8   : > { %p84_p2 = scmp.eq.s32.totalorder %s1183_s13, 1  ;;  %p90_p3 = scmp.eq.s32.totalorder %s749_s14, 1 }
   0x9   : > { %p1192_p4 = por %p40_p1, %p39_p0  ;;  %p750_p5 = scmp.ge.s32.totalorder %s1138_s12, 1 }
   0xa   : > { %p1197_p6 = por %p90_p3, %p39_p0  ;;  %p97_p7 = scmp.lt.s32.totalorder %s1138_s12, 3 }
   0xb   : > { %s108_s19 = sshll.u32 %s1357_s1, 4  ;;  %s1140_s21 = smov [#allocation5]   ;;  %s109_s19 = int_to_ptr.hbm [resolvable:$true] %s108_s19 }
   0xc   : > { %p1205_p8 = pnand %p750_p5, %p97_p7  ;;  %s110_s22 = sshll.u32 %s1140_s21, 4  ;;  %s111_s22 = int_to_ptr.vmem [resolvable:$true] %s110_s22 }
   0xd   : > { %s1215_s23 = sadd.s32 1, %s1138_s12   ;;  %s1141_s24 = smov 128  }
   0xe   : > { %p953_p9 = pneg %p1205_p8  ;;  %s1142_s25 = smov 8  }
   0xf   : > { %s23_s26 = ssub.s32 %s1138_s12, %s1215_s23  ;;  %s26_s27 = sadd.s32 1, %s1134_s11 }
  0x10   : > { %p954_p10 = pnand %p953_p9, %p40_p1  ;;  %p24_p12 = scmp.eq.s32.totalorder %s23_s26, 0 }
  0x11   : > { %p33_p13 = scmp.ne.s32.totalorder %s1134_s11, %s1130_s10  ;;  %p34_p0 = scmp.eq.s32.totalorder %s1138_s12, 0 }
  0x12   : > { %956 = dma.hbm_to_vmem [thread:$0]  (!%p954_p10), %s109_s19, 2048, %s111_s22, [#allocation6], %s1141_s24, %s1141_s24, %s1142_s25  }
  0x13   : > { %p966_p3 = scmp.lt.s32.totalorder %s1138_s12, 2  ;;  %p35_p5 = por %p34_p0, %p33_p13 }
  0x14   : > { %s1225_s28 = scalar_select %p24_p12, %s1134_s11, %s26_s27  }
  0x15   : > { %p1229_p7 = por %p84_p2, %p33_p13  ;;  %s124_s30 = sand.u32 1, %s1134_s11  }
  0x16   : > { %s894_s3 = sshll.u32 %s1138_s12, 7  ;;  %s753_s4 = sshll.u32 %s124_s30, 7 }
  0x17   : > { %s133_s7 = scalar_lea.hbm %s1356_s0, %s894_s3  ;;  %s128_s14 = scalar_lea.vmem [#allocation2], %s753_s4 }
  0x18   : > { %s134_s8 = sshll.u32 %s133_s7, 4  ;;  %s136_s17 = sshll.u32 %s128_s14, 4  ;;  %s135_s8 = int_to_ptr.hbm [resolvable:$true] %s134_s8  ;;  %s137_s17 = int_to_ptr.vmem [resolvable:$true] %s136_s17 }
  0x19   : > { %p1240_p9 = pnand %p966_p3, %p35_p5  ;;  %s125_s19 = scalar_lea.sflag [#allocation3], %s124_s30 }
  0x1a   : > { %s1038_s21 = sshra.s32 %s135_s8, 4  ;;  %s1045_s26 = scalar_lea.hbm %s1356_s0, 256  ;;  %s1039_s21 = int_to_ptr.hbm [resolvable:$true] %s1038_s21 }
  0x1b   : > { %s1040_s22 = scalar_lea.hbm %s1039_s21, 128  ;;  %p1042_p10 = pneg %p1240_p9 }
  0x1c   : > { %p1041_p2 = scmp.ne.s32.totalorder %s1039_s21, %s1040_s22  ;;  %p1046_p0 = scmp.lt.s32.totalorder %s1039_s21, %s1356_s0 }
  0x1d   : > { %p1047_p3 = scmp.lt.s32.totalorder %s1045_s26, %s1040_s22 }
  0x1e   : > { %p1043_p12 = pnand %p1042_p10, %p1041_p2 }
  0x1f   : > { %p1048_p5 = por %p1047_p3, %p1046_p0 }
  0x20   : > { %p1044_p13 = pneg %p1043_p12 }
  0x22   : > { %p1049_p11 = pnand %p1048_p5, %p1044_p13 }
  0x24   : > { %1052 = shalt.err (!%p1049_p11)
}
  0x25   : > { %s1143_s30 = smov 64   ;;  %s1144_s4 = smov 4  }
  0x26   : > { %960 = dma.hbm_to_vmem [thread:$0]  (!%p1240_p9), %s135_s8, 2048, %s137_s17, %s125_s19, %s1143_s30, %s1143_s30, %s1144_s4  }
  0x27   : > { %148 = sbr.rel (%p1205_p8) target bundleno = 340 (0x154), region = 28  ;;  %s1257_s5 = sand.u32 (!%p1205_p8), 1, %s1130_s10  }
  0x28   : > { %s757_s6 = sshll.u32 (!%p1205_p8), %s1257_s5, 7  ;;  %s151_s7 = scalar_lea.sflag (!%p1205_p8), [#allocation3], %s1257_s5 }
  0x29   : > { %s1261_s14 = scalar_lea.vmem (!%p1205_p8), [#allocation2], %s757_s6 }
  0x2c   : > { %1113 = dma.done.wait (%p1192_p4), %s151_s7, 2048  }
  0x2d   : > { %1115 = vsyncadd (%p1192_p4), %s151_s7, 4294965248 }
  0x2e   : > { %1117 = dma.done.wait (%p40_p1), [#allocation6], 2048  }
  0x2f   : > { %1119 = vsyncadd (%p40_p1), [#allocation6], 4294965248  ;;  %v882_v0 = vld [vmem:[#allocation5 + $0x70] sm:$0xf]  ;;  %v926_v1 = vld [vmem:[#allocation5 + $0x74] sm:$0xf0] }
  0x30   : > { %v925_v2 = vld [vmem:[#allocation5 + $0x74] sm:$0xf]  ;;  %v883_v3 = vor.u32 %v926_v1, %v882_v0  ;;  %v884_v4 = vld [vmem:[#allocation5 + $0x78] sm:$0xf0]  ;;  %v874_v5 = vld [vmem:[#allocation5 + $0x60] sm:$0xf] }
  0x31   : > { %v924_v6 = vld [vmem:[#allocation5 + $0x64] sm:$0xf0]  ;;  %v887_v7 = vor.u32 %v925_v2, %v884_v4  ;;  %v923_v8 = vld [vmem:[#allocation5 + $0x64] sm:$0xf]  ;;  %v876_v9 = vld [vmem:[#allocation5 + $0x68] sm:$0xf0] }
  0x32   : > { %407 = vmatpush.bf16.msra.mxu0 %v883_v3  ;;  %929 = vmatpush.bf16.msra.mxu2 %v883_v3  ;;  %v875_v10 = vor.u32 %v924_v6, %v874_v5  ;;  %v879_v11 = vor.u32 %v923_v8, %v876_v9  ;;  %v866_v12 = vld [vmem:[#allocation5 + $0x50] sm:$0xf]  ;;  %v922_v13 = vld [vmem:[#allocation5 + $0x54] sm:$0xf0]  ;;  %v921_v14 = vld [vmem:[#allocation5 + $0x54] sm:$0xf] }
  0x33   : > { %496 = vmatpush.bf16.msra.mxu1 %v887_v7  ;;  %937 = vmatpush.bf16.msra.mxu3 %v887_v7  ;;  %v868_v15 = vld [vmem:[#allocation5 + $0x58] sm:$0xf0]  ;;  %v867_v16 = vor.u32 %v922_v13, %v866_v12  ;;  %v858_v18 = vld [vmem:[#allocation5 + $0x40] sm:$0xf]  ;;  %v920_v19 = vld [vmem:[#allocation5 + $0x44] sm:$0xf0] }
  0x34   : > { %v871_v17 = vor.u32 %v921_v14, %v868_v15  ;;  %v919_v20 = vld [vmem:[#allocation5 + $0x44] sm:$0xf]  ;;  %v860_v21 = vld [vmem:[#allocation5 + $0x48] sm:$0xf0]  ;;  %v859_v22 = vor.u32 %v920_v19, %v858_v18  ;;  %v850_v24 = vld [vmem:[#allocation5 + $0x30] sm:$0xf] }
  0x35   : > { %v863_v23 = vor.u32 %v919_v20, %v860_v21  ;;  %v918_v25 = vld [vmem:[#allocation5 + $0x34] sm:$0xf0]  ;;  %v917_v26 = vld [vmem:[#allocation5 + $0x34] sm:$0xf]  ;;  %v852_v27 = vld [vmem:[#allocation5 + $0x38] sm:$0xf0] }
  0x36   : > { %408 = vmatpush.bf16.msra.mxu0 %v875_v10  ;;  %930 = vmatpush.bf16.msra.mxu2 %v875_v10  ;;  %v851_v28 = vor.u32 %v918_v25, %v850_v24  ;;  %v855_v29 = vor.u32 %v917_v26, %v852_v27  ;;  %v842_v30 = vld [vmem:[#allocation5 + $0x20] sm:$0xf]  ;;  %v916_v31 = vld [vmem:[#allocation5 + $0x24] sm:$0xf0]  ;;  %v915_v32 = vld [vmem:[#allocation5 + $0x24] sm:$0xf] }
  0x37   : > { %497 = vmatpush.bf16.msra.mxu1 %v879_v11  ;;  %938 = vmatpush.bf16.msra.mxu3 %v879_v11  ;;  %v844_v33 = vld [vmem:[#allocation5 + $0x28] sm:$0xf0]  ;;  %v843_v34 = vor.u32 %v916_v31, %v842_v30  ;;  %v834_v36 = vld [vmem:[#allocation5 + $0x10] sm:$0xf]  ;;  %v914_v37 = vld [vmem:[#allocation5 + $0x14] sm:$0xf0] }
  0x38   : > { %v847_v35 = vor.u32 %v915_v32, %v844_v33  ;;  %v913_v38 = vld [vmem:[#allocation5 + $0x14] sm:$0xf]  ;;  %v836_v39 = vld [vmem:[#allocation5 + $0x18] sm:$0xf0]  ;;  %v835_v40 = vor.u32 %v914_v37, %v834_v36  ;;  %v826_v42 = vld [vmem:[#allocation5] sm:$0xf] }
  0x39   : > { %v839_v41 = vor.u32 %v913_v38, %v836_v39  ;;  %v912_v43 = vld [vmem:[#allocation5 + $0x4] sm:$0xf0]  ;;  %v911_v44 = vld [vmem:[#allocation5 + $0x4] sm:$0xf]  ;;  %v828_v45 = vld [vmem:[#allocation5 + $0x8] sm:$0xf0] }
  0x3a   : > { %409 = vmatpush.bf16.msra.mxu0 %v867_v16  ;;  %931 = vmatpush.bf16.msra.mxu2 %v867_v16  ;;  %v827_v46 = vor.u32 %v912_v43, %v826_v42  ;;  %v831_v47 = vor.u32 %v911_v44, %v828_v45  ;;  %v895_v48 = vld [vmem:[%s1261_s14] sm:$0xff]  ;;  %v896_v50 = vld [vmem:[%s1261_s14 + $0x8] sm:$0xff]  ;;  %v897_v52 = vld [vmem:[%s1261_s14 + $0x10] sm:$0xff]  ;;  %s759_s15 = sshll.u32 %s1257_s5, 8  ;;  %s928_s8 = sshll.u32 %s1183_s13, 8 }
  0x3b   : > { %498 = vmatpush.bf16.msra.mxu1 %v871_v17  ;;  %939 = vmatpush.bf16.msra.mxu3 %v871_v17  ;;  %v903_v49 = vld [vmem:[%s1261_s14 + $0x40] sm:$0xff]  ;;  %v904_v51 = vld [vmem:[%s1261_s14 + $0x48] sm:$0xff]  ;;  %v905_v53 = vld [vmem:[%s1261_s14 + $0x50] sm:$0xff]  ;;  %s1288_s20 = scalar_lea.vmem [#allocation7], %s759_s15  ;;  %s662_s19 = scalar_lea.hbm %s1358_s2, %s928_s8 }
  0x3c   : > { %v898_v54 = vld [vmem:[%s1261_s14 + $0x18] sm:$0xff]  ;;  %v899_v56 = vld [vmem:[%s1261_s14 + $0x20] sm:$0xff]  ;;  %v900_v58 = vld [vmem:[%s1261_s14 + $0x28] sm:$0xff]  ;;  %s663_s21 = sshll.u32 %s1288_s20, 4  ;;  %s665_s22 = sshll.u32 %s662_s19, 4  ;;  %s664_s21 = int_to_ptr.vmem [resolvable:$true] %s663_s21  ;;  %s666_s22 = int_to_ptr.hbm [resolvable:$true] %s665_s22 }
  0x3d   : > { %v906_v55 = vld [vmem:[%s1261_s14 + $0x58] sm:$0xff]  ;;  %v907_v57 = vld [vmem:[%s1261_s14 + $0x60] sm:$0xff]  ;;  %v908_v59 = vld [vmem:[%s1261_s14 + $0x68] sm:$0xff]  ;;  %s650_s13 = scalar_lea.sflag [#allocation4], %s1257_s5  ;;  %s1082_s24 = sshra.s32 %s666_s22, 4  ;;  %s1083_s24 = int_to_ptr.hbm [resolvable:$true] %s1082_s24 }
  0x3e   : > { %410 = vmatpush.bf16.msra.mxu0 %v859_v22  ;;  %932 = vmatpush.bf16.msra.mxu2 %v859_v22  ;;  %v901_v60 = vld [vmem:[%s1261_s14 + $0x30] sm:$0xff]  ;;  %v902_v62 = vld [vmem:[%s1261_s14 + $0x38] sm:$0xff]  ;;  %s1084_s25 = scalar_lea.hbm %s1083_s24, 256  ;;  %s1088_s3 = scalar_lea.hbm %s1358_s2, 512 }
  0x3f   : > { %499 = vmatpush.bf16.msra.mxu1 %v863_v23  ;;  %940 = vmatpush.bf16.msra.mxu3 %v863_v23  ;;  %v909_v61 = vld [vmem:[%s1261_s14 + $0x70] sm:$0xff]  ;;  %v910_v63 = vld [vmem:[%s1261_s14 + $0x78] sm:$0xff]  ;;  %p1085_p1 = scmp.ne.s32.totalorder %s1083_s24, %s1084_s25  ;;  %p1089_p11 = scmp.lt.s32.totalorder %s1083_s24, %s1358_s2 }
  0x40   : > { %p1090_p9 = scmp.lt.s32.totalorder %s1088_s3, %s1084_s25 }
  0x41   : > { %p1086_p4 = pnand %p1085_p1, %p1229_p7 }
  0x42   : > { %411 = vmatpush.bf16.msra.mxu0 %v851_v28  ;;  %933 = vmatpush.bf16.msra.mxu2 %v851_v28  ;;  %p1091_p2 = por %p1090_p9, %p1089_p11 }
  0x43   : > { %500 = vmatpush.bf16.msra.mxu1 %v855_v29  ;;  %941 = vmatpush.bf16.msra.mxu3 %v855_v29  ;;  %p1087_p8 = pneg %p1086_p4 }
  0x45   : > { %p1092_p10 = pnand %p1091_p2, %p1087_p8 }
  0x46   : > { %412 = vmatpush.bf16.msra.mxu0 %v843_v34  ;;  %934 = vmatpush.bf16.msra.mxu2 %v843_v34 }
  0x47   : > { %501 = vmatpush.bf16.msra.mxu1 %v847_v35  ;;  %942 = vmatpush.bf16.msra.mxu3 %v847_v35 }
  0x4a   : > { %413 = vmatpush.bf16.msra.mxu0 %v835_v40  ;;  %935 = vmatpush.bf16.msra.mxu2 %v835_v40 }
  0x4b   : > { %502 = vmatpush.bf16.msra.mxu1 %v839_v41  ;;  %943 = vmatpush.bf16.msra.mxu3 %v839_v41 }
  0x4e   : > { %414 = vmatpush.bf16.msra.mxu0 %v827_v46  ;;  %936 = vmatpush.bf16.msra.mxu2 %v827_v46 }
  0x4f   : > { %503 = vmatpush.bf16.msra.mxu1 %v831_v47  ;;  %944 = vmatpush.bf16.msra.mxu3 %v831_v47 }
  0x51   : > { %415 = vmatmul.bf16.vlgmr.msra.gmra.mxu0 %v895_v48  ;;  %455 = vmatmul.bf16.vlgmr.msra.gmra.mxu2 %v903_v49 }
  0x52   : > { %504 = vmatmul.bf16.vlgmr.msra.gmra.mxu1 %v895_v48  ;;  %544 = vmatmul.bf16.vlgmr.msra.gmra.mxu3 %v903_v49 }
  0x61   : > { %420 = vmatmul.bf16.gmra.mxu0 %v896_v50  ;;  %460 = vmatmul.bf16.gmra.mxu2 %v904_v51 }
  0x62   : > { %509 = vmatmul.bf16.gmra.mxu1 %v896_v50  ;;  %549 = vmatmul.bf16.gmra.mxu3 %v904_v51 }
  0x71   : > { %425 = vmatmul.bf16.gmra.mxu0 %v897_v52  ;;  %465 = vmatmul.bf16.gmra.mxu2 %v905_v53 }
  0x72   : > { %514 = vmatmul.bf16.gmra.mxu1 %v897_v52  ;;  %554 = vmatmul.bf16.gmra.mxu3 %v905_v53 }
  0x81   : > { %430 = vmatmul.bf16.gmra.mxu0 %v898_v54  ;;  %470 = vmatmul.bf16.gmra.mxu2 %v906_v55 }
  0x82   : > { %519 = vmatmul.bf16.gmra.mxu1 %v898_v54  ;;  %559 = vmatmul.bf16.gmra.mxu3 %v906_v55 }
  0x91   : > { %435 = vmatmul.bf16.gmra.mxu0 %v899_v56  ;;  %475 = vmatmul.bf16.gmra.mxu2 %v907_v57 }
  0x92   : > { %524 = vmatmul.bf16.gmra.mxu1 %v899_v56  ;;  %564 = vmatmul.bf16.gmra.mxu3 %v907_v57 }
  0xa1   : > { %440 = vmatmul.bf16.gmra.mxu0 %v900_v58  ;;  %480 = vmatmul.bf16.gmra.mxu2 %v908_v59 }
  0xa2   : > { %529 = vmatmul.bf16.gmra.mxu1 %v900_v58  ;;  %569 = vmatmul.bf16.gmra.mxu3 %v908_v59 }
  0xb1   : > { %445 = vmatmul.bf16.gmra.mxu0 %v901_v60  ;;  %485 = vmatmul.bf16.gmra.mxu2 %v909_v61 }
  0xb2   : > { %534 = vmatmul.bf16.gmra.mxu1 %v901_v60  ;;  %574 = vmatmul.bf16.gmra.mxu3 %v909_v61 }
  0xc1   : > { %450 = vmatmul.bf16.gmra.mxu0 %v902_v62  ;;  %490 = vmatmul.bf16.gmra.mxu2 %v910_v63 }
  0xc2   : > { %539 = vmatmul.bf16.gmra.mxu1 %v902_v62  ;;  %579 = vmatmul.bf16.gmra.mxu3 %v910_v63 }
  0xce   : > { %v416_v0 = vpop.f32.mrf.mxu0 }
  0xcf   : > { %v505_v1 = vpop.f32.mrf.mxu1 }
  0xd0   : > { %v585_v2 = vpack.c.bf16 %v505_v1, %v416_v0 }
  0xd2   : > { %617 = vst [vmem:[%s1288_s20] sm:$0xff] %v585_v2 }
  0xd4   : > { %v456_v3 = vpop.f32.mrf.mxu2 }
  0xd5   : > { %v545_v4 = vpop.f32.mrf.mxu3 }
  0xd6   : > { %v601_v5 = vpack.c.bf16 %v545_v4, %v456_v3  ;;  %v418_v6 = vpop.f32.mrf.mxu0 }
  0xd7   : > { %v507_v7 = vpop.f32.mrf.mxu1 }
  0xd8   : > { %633 = vst [vmem:[%s1288_s20 + $0x80] sm:$0xff] %v601_v5  ;;  %v586_v8 = vpack.c.bf16 %v507_v7, %v418_v6 }
  0xda   : > { %618 = vst [vmem:[%s1288_s20 + $0x8] sm:$0xff] %v586_v8 }
  0xdc   : > { %v458_v9 = vpop.f32.mrf.mxu2 }
  0xdd   : > { %v547_v10 = vpop.f32.mrf.mxu3 }
  0xde   : > { %v602_v11 = vpack.c.bf16 %v547_v10, %v458_v9  ;;  %v421_v12 = vpop.f32.mrf.mxu0 }
  0xdf   : > { %v510_v13 = vpop.f32.mrf.mxu1 }
  0xe0   : > { %634 = vst [vmem:[%s1288_s20 + $0x88] sm:$0xff] %v602_v11  ;;  %v587_v14 = vpack.c.bf16 %v510_v13, %v421_v12 }
  0xe2   : > { %619 = vst [vmem:[%s1288_s20 + $0x10] sm:$0xff] %v587_v14 }
  0xe4   : > { %v461_v15 = vpop.f32.mrf.mxu2 }
  0xe5   : > { %v550_v16 = vpop.f32.mrf.mxu3 }
  0xe6   : > { %v603_v17 = vpack.c.bf16 %v550_v16, %v461_v15  ;;  %v423_v18 = vpop.f32.mrf.mxu0 }
  0xe7   : > { %v512_v19 = vpop.f32.mrf.mxu1 }
  0xe8   : > { %635 = vst [vmem:[%s1288_s20 + $0x90] sm:$0xff] %v603_v17  ;;  %v588_v20 = vpack.c.bf16 %v512_v19, %v423_v18 }
  0xea   : > { %620 = vst [vmem:[%s1288_s20 + $0x18] sm:$0xff] %v588_v20 }
  0xec   : > { %v463_v21 = vpop.f32.mrf.mxu2 }
  0xed   : > { %v552_v22 = vpop.f32.mrf.mxu3 }
  0xee   : > { %v604_v23 = vpack.c.bf16 %v552_v22, %v463_v21  ;;  %v426_v24 = vpop.f32.mrf.mxu0 }
  0xef   : > { %v515_v25 = vpop.f32.mrf.mxu1 }
  0xf0   : > { %636 = vst [vmem:[%s1288_s20 + $0x98] sm:$0xff] %v604_v23  ;;  %v589_v26 = vpack.c.bf16 %v515_v25, %v426_v24 }
  0xf2   : > { %621 = vst [vmem:[%s1288_s20 + $0x20] sm:$0xff] %v589_v26 }
  0xf4   : > { %v466_v27 = vpop.f32.mrf.mxu2 }
  0xf5   : > { %v555_v28 = vpop.f32.mrf.mxu3 }
  0xf6   : > { %v605_v29 = vpack.c.bf16 %v555_v28, %v466_v27  ;;  %v428_v30 = vpop.f32.mrf.mxu0 }
  0xf7   : > { %v517_v31 = vpop.f32.mrf.mxu1 }
  0xf8   : > { %637 = vst [vmem:[%s1288_s20 + $0xa0] sm:$0xff] %v605_v29  ;;  %v590_v32 = vpack.c.bf16 %v517_v31, %v428_v30 }
  0xfa   : > { %622 = vst [vmem:[%s1288_s20 + $0x28] sm:$0xff] %v590_v32 }
  0xfc   : > { %v468_v33 = vpop.f32.mrf.mxu2 }
  0xfd   : > { %v557_v34 = vpop.f32.mrf.mxu3 }
  0xfe   : > { %v606_v35 = vpack.c.bf16 %v557_v34, %v468_v33  ;;  %v431_v36 = vpop.f32.mrf.mxu0 }
  0xff   : > { %v520_v37 = vpop.f32.mrf.mxu1 }
 0x100   : > { %638 = vst [vmem:[%s1288_s20 + $0xa8] sm:$0xff] %v606_v35  ;;  %v591_v38 = vpack.c.bf16 %v520_v37, %v431_v36 }
 0x102   : > { %623 = vst [vmem:[%s1288_s20 + $0x30] sm:$0xff] %v591_v38 }
 0x104   : > { %v471_v39 = vpop.f32.mrf.mxu2 }
 0x105   : > { %v560_v40 = vpop.f32.mrf.mxu3 }
 0x106   : > { %v607_v41 = vpack.c.bf16 %v560_v40, %v471_v39  ;;  %v433_v42 = vpop.f32.mrf.mxu0 }
 0x107   : > { %v522_v43 = vpop.f32.mrf.mxu1 }
 0x108   : > { %639 = vst [vmem:[%s1288_s20 + $0xb0] sm:$0xff] %v607_v41  ;;  %v592_v44 = vpack.c.bf16 %v522_v43, %v433_v42 }
 0x10a   : > { %624 = vst [vmem:[%s1288_s20 + $0x38] sm:$0xff] %v592_v44 }
 0x10c   : > { %v473_v45 = vpop.f32.mrf.mxu2 }
 0x10d   : > { %v562_v46 = vpop.f32.mrf.mxu3 }
 0x10e   : > { %v608_v47 = vpack.c.bf16 %v562_v46, %v473_v45  ;;  %v436_v48 = vpop.f32.mrf.mxu0 }
 0x10f   : > { %v525_v49 = vpop.f32.mrf.mxu1 }
 0x110   : > { %640 = vst [vmem:[%s1288_s20 + $0xb8] sm:$0xff] %v608_v47  ;;  %v593_v50 = vpack.c.bf16 %v525_v49, %v436_v48 }
 0x112   : > { %625 = vst [vmem:[%s1288_s20 + $0x40] sm:$0xff] %v593_v50 }
 0x114   : > { %v476_v51 = vpop.f32.mrf.mxu2 }
 0x115   : > { %v565_v52 = vpop.f32.mrf.mxu3 }
 0x116   : > { %v609_v53 = vpack.c.bf16 %v565_v52, %v476_v51  ;;  %v438_v54 = vpop.f32.mrf.mxu0 }
 0x117   : > { %v527_v55 = vpop.f32.mrf.mxu1 }
 0x118   : > { %641 = vst [vmem:[%s1288_s20 + $0xc0] sm:$0xff] %v609_v53  ;;  %v594_v56 = vpack.c.bf16 %v527_v55, %v438_v54 }
 0x11a   : > { %626 = vst [vmem:[%s1288_s20 + $0x48] sm:$0xff] %v594_v56 }
 0x11c   : > { %v478_v57 = vpop.f32.mrf.mxu2 }
 0x11d   : > { %v567_v58 = vpop.f32.mrf.mxu3 }
 0x11e   : > { %v610_v59 = vpack.c.bf16 %v567_v58, %v478_v57  ;;  %v441_v60 = vpop.f32.mrf.mxu0 }
 0x11f   : > { %v530_v61 = vpop.f32.mrf.mxu1 }
 0x120   : > { %642 = vst [vmem:[%s1288_s20 + $0xc8] sm:$0xff] %v610_v59  ;;  %v595_v62 = vpack.c.bf16 %v530_v61, %v441_v60 }
 0x122   : > { %627 = vst [vmem:[%s1288_s20 + $0x50] sm:$0xff] %v595_v62 }
 0x124   : > { %v481_v63 = vpop.f32.mrf.mxu2 }
 0x125   : > { %v570_v0 = vpop.f32.mrf.mxu3 }
 0x126   : > { %v611_v1 = vpack.c.bf16 %v570_v0, %v481_v63  ;;  %v443_v2 = vpop.f32.mrf.mxu0 }
 0x127   : > { %v532_v3 = vpop.f32.mrf.mxu1 }
 0x128   : > { %643 = vst [vmem:[%s1288_s20 + $0xd0] sm:$0xff] %v611_v1  ;;  %v596_v4 = vpack.c.bf16 %v532_v3, %v443_v2 }
 0x12a   : > { %628 = vst [vmem:[%s1288_s20 + $0x58] sm:$0xff] %v596_v4 }
 0x12c   : > { %v483_v5 = vpop.f32.mrf.mxu2 }
 0x12d   : > { %v572_v6 = vpop.f32.mrf.mxu3 }
 0x12e   : > { %v612_v7 = vpack.c.bf16 %v572_v6, %v483_v5  ;;  %v446_v8 = vpop.f32.mrf.mxu0 }
 0x12f   : > { %v535_v9 = vpop.f32.mrf.mxu1 }
 0x130   : > { %644 = vst [vmem:[%s1288_s20 + $0xd8] sm:$0xff] %v612_v7  ;;  %v597_v10 = vpack.c.bf16 %v535_v9, %v446_v8 }
 0x132   : > { %629 = vst [vmem:[%s1288_s20 + $0x60] sm:$0xff] %v597_v10 }
 0x134   : > { %v486_v11 = vpop.f32.mrf.mxu2 }
 0x135   : > { %v575_v12 = vpop.f32.mrf.mxu3 }
 0x136   : > { %v613_v13 = vpack.c.bf16 %v575_v12, %v486_v11  ;;  %v448_v14 = vpop.f32.mrf.mxu0 }
 0x137   : > { %v537_v15 = vpop.f32.mrf.mxu1 }
 0x138   : > { %645 = vst [vmem:[%s1288_s20 + $0xe0] sm:$0xff] %v613_v13  ;;  %v598_v16 = vpack.c.bf16 %v537_v15, %v448_v14 }
 0x13a   : > { %630 = vst [vmem:[%s1288_s20 + $0x68] sm:$0xff] %v598_v16 }
 0x13c   : > { %v488_v17 = vpop.f32.mrf.mxu2 }
 0x13d   : > { %v577_v18 = vpop.f32.mrf.mxu3 }
 0x13e   : > { %v614_v19 = vpack.c.bf16 %v577_v18, %v488_v17  ;;  %v451_v20 = vpop.f32.mrf.mxu0 }
 0x13f   : > { %v540_v21 = vpop.f32.mrf.mxu1 }
 0x140   : > { %646 = vst [vmem:[%s1288_s20 + $0xe8] sm:$0xff] %v614_v19  ;;  %v599_v22 = vpack.c.bf16 %v540_v21, %v451_v20 }
 0x142   : > { %631 = vst [vmem:[%s1288_s20 + $0x70] sm:$0xff] %v599_v22 }
 0x144   : > { %v491_v23 = vpop.f32.mrf.mxu2 }
 0x145   : > { %v580_v24 = vpop.f32.mrf.mxu3 }
 0x146   : > { %v615_v25 = vpack.c.bf16 %v580_v24, %v491_v23  ;;  %v453_v26 = vpop.f32.mrf.mxu0 }
 0x147   : > { %v542_v27 = vpop.f32.mrf.mxu1 }
 0x148   : > { %647 = vst [vmem:[%s1288_s20 + $0xf0] sm:$0xff] %v615_v25  ;;  %v600_v28 = vpack.c.bf16 %v542_v27, %v453_v26 }
 0x14a   : > { %632 = vst [vmem:[%s1288_s20 + $0x78] sm:$0xff] %v600_v28 }
 0x14c   : > { %v493_v29 = vpop.f32.mrf.mxu2 }
 0x14d   : > { %v582_v30 = vpop.f32.mrf.mxu3 }
 0x14e   : > { %v616_v31 = vpack.c.bf16 %v582_v30, %v493_v29 }
 0x150   : > { %648 = vst [vmem:[%s1288_s20 + $0xf8] sm:$0xff] %v616_v31 }
 0x151   : > { %1095 = shalt.err (!%p1092_p10)
}
 0x152   : > { %s1145_s5 = smov 128   ;;  %s1146_s6 = smov 8  }
 0x153   : > { %951 = dma.vmem_to_hbm [thread:$0]  (%p1229_p7), %s664_s21, 4096, %s666_s22, %s650_s13, %s1145_s5, %s1145_s5, %s1146_s6  }
 0x154 PF: > { %s680_s7 = sand.u32 1, %s1126_s9   ;;  %p1364_p12 = scmp.ge.s32.totalorder %s1138_s12, 2 }
 0x155   : > { %s681_s14 = scalar_lea.sflag [#allocation4], %s680_s7 }
 0x156   : > { %p962_p13 = pnand %p1364_p12, %p1197_p6 }
 0x158   : > { %p963_p0 = pneg %p962_p13 }
 0x15a   : > { %1121 = dma.done.wait (%p963_p0), %s681_s14, 4096  }
 0x15b   : > { %1123 = vsyncadd (%p963_p0), %s681_s14, 4294963200  ;;  %p16_p3 = scmp.ge.s32.totalorder %s1215_s23, 4   ;;  %s1365_s9 = smov %s1130_s10 }
 0x15c   : > { %s1366_s10 = smov %s1134_s11  ;;  %s1367_s11 = smov %s1225_s28 }
 0x15d   : > { %s1368_s12 = smov %s1215_s23  ;;  %18 = sbr.rel (!%p16_p3) target bundleno = 6 (0x6), region = 77 }
 0x162   :  { %687 = vsyncpa [#allocation3], 1 }
 0x163   :  { %689 = vsyncpa [#allocation3 + $0x1], 1 }
 0x164   :  { %690 = vsyncpa [#allocation6], 1 }
 0x165   :  { %691 = vsyncpa [#allocation4], 1 }
 0x166   :  { %693 = vsyncpa [#allocation4 + $0x1], 1 }

</bundles_post_ra>
